<compile_context>
chip_gen: v5e
topology: v5e:2x2
jax: 0.10.0
libtpu: 0.0.40
codegen_flags: <defaults>
</compile_context>

<pallas_src>
import functools

import jax
import jax.numpy as jnp
from jax.experimental import pallas as pl
from jax.experimental.pallas import tpu as pltpu

ALPHA = 0.5
BETA = 0.5
CLAMP_MIN = 1e-12


# ---------------------------------------------------------------------------
# Kernel
# ---------------------------------------------------------------------------
def _cf_loss_tile_kernel(x_ref, tgt_ref, tyx_ref, tyt_ref, px_ref, pt_ref,
                         comb_ref, *, alpha, beta):
    # Per-T-tile block shapes (native layouts, T on sublanes for ty):
    #   x, tgt : (B, tT)         ty : (B, tT, K)        proj : (B, K)
    #   comb   : (1, tT)  (lane-dense output)
    # Upcast to f32 in-kernel (inputs may arrive as bf16).
    x = x_ref[...].astype(jnp.float32)
    tgt = tgt_ref[...].astype(jnp.float32)
    tyx = tyx_ref[...].astype(jnp.float32)
    tyt = tyt_ref[...].astype(jnp.float32)
    px = px_ref[...].astype(jnp.float32)[:, None, :]    # (B, 1, K)
    pt = pt_ref[...].astype(jnp.float32)[:, None, :]    # (B, 1, K)

    # calculate_ygx: bmm(ty (B,T,K), proj (B,K,1)) -> (B,T), expressed as a
    # lane-axis (K) multiply-reduce on the VPU/XLU.  Streaming f32 from HBM
    # keeps this memory-bound, so no MXU contraction is needed.
    ty_x = jnp.sum(tyx * px, axis=-1)    # (B, tT)
    ty_t = jnp.sum(tyt * pt, axis=-1)    # (B, tT)

    def calc_fai(out, ty):
        phase = out + ty                                        # (B, tT)
        re = jnp.mean(jnp.cos(phase), axis=0, keepdims=True)    # (1, tT)
        im = jnp.mean(jnp.sin(phase), axis=0, keepdims=True)    # (1, tT)
        norm = jnp.sqrt(re * re + im * im)                      # (1, tT)
        return re, im, norm

    x_re, x_im, x_norm = calc_fai(x, ty_x)
    t_re, t_im, t_norm = calc_fai(tgt, ty_t)

    amp_diff = t_norm - x_norm
    loss_amp = jnp.maximum(amp_diff * amp_diff, CLAMP_MIN)
    loss_pha = jnp.maximum(
        2.0 * (t_norm * x_norm - x_re * t_re - x_im * t_im), CLAMP_MIN)

    # Per-element combined loss; mean over the FULL T and the sqrt happen in
    # the wrapper (lane-dense stores here).
    comb_ref[...] = alpha * loss_amp + beta * loss_pha          # (1, tT)


# ---------------------------------------------------------------------------
# Tile / VMEM sizing
# ---------------------------------------------------------------------------
def _vmem_budget():
    """Generation-aware (working-set budget, scoped vmem limit) in bytes."""
    vmem_cap = None
    try:
        info = pltpu.get_tpu_info()
        vmem_cap = getattr(info, "vmem_capacity_bytes", None)
    except Exception:
        vmem_cap = None
    if vmem_cap is None:
        vmem_cap = 64 * 1024 * 1024          # conservative: v7x per-TC VMEM
    if vmem_cap <= 64 * 1024 * 1024:         # v7x (64 MiB per TensorCore)
        return 24 * 1024 * 1024, 48 * 1024 * 1024
    # v5e / v6e (128 MiB physical VMEM)
    return 48 * 1024 * 1024, 64 * 1024 * 1024


def _choose_tile_t(T, B, K, budget):
    """Return (tile_t, T_pad) for tiling the T axis.

    Per-T-element VMEM bytes include: K padded to 128 lanes for the ty blocks,
    B padded to 8 sublanes for the 2-D blocks, triple-buffered ty streams,
    double-buffered x/target/output blocks and in-kernel (B, tile, K)
    intermediates (products / f32 upcasts).
    """
    k_pad = max(128, ((K + 127) // 128) * 128)
    b_pad = max(8, ((B + 7) // 8) * 8)
    per_t = 4 * (3 * 2 * B * k_pad      # ty_x / ty_target input buffers (x3)
                 + 4 * B * k_pad        # in-kernel products / upcast copies
                 + 2 * 2 * b_pad        # x / target input buffers (x2)
                 + 2 * 8                # (1, tile) output buffers (x2)
                 + 16 * 8)              # small 2-D f32 temporaries
    max_tile = max(128, (budget // per_t) // 128 * 128)

    if T <= max_tile:
        return T, T                      # single full-T block, fits the budget

    # Tiled path: largest 128-multiple divisor of T under the budget,
    # preferring an even number of grid steps (balances v7x's two cores).
    best_any = best_even = None
    for cand in range(max_tile, 127, -128):
        if T % cand == 0:
            if best_any is None:
                best_any = cand
            if (T // cand) % 2 == 0:
                best_even = cand
                break
    if best_even is not None:
        return best_even, T
    if best_any is not None:
        return best_any, T

    # Ragged T: pad up to a multiple of the largest fitting tile; the padded
    # lanes are sliced off in the wrapper before the final sum.
    t_pad = ((T + max_tile - 1) // max_tile) * max_tile
    return max_tile, t_pad


# ---------------------------------------------------------------------------
# Wrapper
# ---------------------------------------------------------------------------
def cf_loss_func_cond(x, target, ty_x, ty_target, proj_x, proj_target,
                      alpha=ALPHA, beta=BETA, tile_t_override=None):
    """Pallas implementation of CFLossFuncCond.forward. Returns scalar loss.

    tile_t_override (testing only): force a T-tile width (multiple of 128,
    or >= T for a single tile).
    """
    B, T = x.shape
    K = ty_x.shape[-1]
    assert target.shape == (B, T)
    assert ty_x.shape == (B, T, K) and ty_target.shape == (B, T, K)
    assert proj_x.shape == (B, K) and proj_target.shape == (B, K)

    budget, vmem_limit = _vmem_budget()
    if tile_t_override is not None:
        if tile_t_override >= T:
            tile_t, t_pad = T, T
        else:
            tile_t = tile_t_override
            t_pad = ((T + tile_t - 1) // tile_t) * tile_t
    else:
        tile_t, t_pad = _choose_tile_t(T, B, K, budget)

    if t_pad != T:
        pad = t_pad - T
        x = jnp.pad(x, ((0, 0), (0, pad)))
        target = jnp.pad(target, ((0, 0), (0, pad)))
        ty_x = jnp.pad(ty_x, ((0, 0), (0, pad), (0, 0)))
        ty_target = jnp.pad(ty_target, ((0, 0), (0, pad), (0, 0)))

    n_steps = t_pad // tile_t
    grid = (n_steps,)

    # Deeper buffering on the dominant (ty) streams when the grid is long
    # enough for it to matter; default double-buffering otherwise.
    if n_steps > 2:
        ty_spec = pl.BlockSpec((B, tile_t, K), lambda i: (0, i, 0),
                               pipeline_mode=pl.Buffered(3))
    else:
        ty_spec = pl.BlockSpec((B, tile_t, K), lambda i: (0, i, 0))

    kernel = functools.partial(_cf_loss_tile_kernel, alpha=alpha, beta=beta)

    combined = pl.pallas_call(
        kernel,
        out_shape=jax.ShapeDtypeStruct((1, t_pad), jnp.float32),
        grid=grid,
        in_specs=[
            pl.BlockSpec((B, tile_t), lambda i: (0, i)),        # x
            pl.BlockSpec((B, tile_t), lambda i: (0, i)),        # target
            ty_spec,                                            # ty_x (B,T,K)
            ty_spec,                                            # ty_target
            pl.BlockSpec((B, K), lambda i: (0, 0)),             # proj_x
            pl.BlockSpec((B, K), lambda i: (0, 0)),             # proj_target
        ],
        out_specs=pl.BlockSpec((1, tile_t), lambda i: (0, i)),
        compiler_params=pltpu.CompilerParams(
            # TODO(synk): confirm "parallel" shards the T grid across v7x's
            # two TensorCores; switch to pltpu.CORE_PARALLEL if it does not.
            dimension_semantics=("parallel",),
            vmem_limit_bytes=vmem_limit),
    )(x, target, ty_x, ty_target, proj_x, proj_target)

    # Mask any padded lanes by slicing back to the real T, then the tiny final
    # reduce: divide by the FULL T and sqrt.
    return jnp.sqrt(jnp.sum(combined[:, :T]) / T)


# ---------------------------------------------------------------------------
# Pure-JAX reference + self-test
# ---------------------------------------------------------------------------
def _reference(x, target, ty_x, ty_target, proj_x, proj_target,
               alpha=ALPHA, beta=BETA):
    """Pure-JAX reference mirroring the PyTorch module."""
    def ygx(ty, proj):
        return jnp.einsum('btk,bk->bt', ty, proj)

    def fai(out, ty):
        re = jnp.mean(jnp.cos(out + ty), axis=0, keepdims=True)
        im = jnp.mean(jnp.sin(out + ty), axis=0, keepdims=True)
        return re, im, jnp.sqrt(re * re + im * im)

    tyx = ygx(ty_x, proj_x)
    tyt = ygx(ty_target, proj_target)
    x_re, x_im, x_n = fai(x, tyx)
    t_re, t_im, t_n = fai(target, tyt)
    amp = t_n - x_n
    la = jnp.maximum(amp * amp, CLAMP_MIN)
    lp = jnp.maximum(2.0 * (t_n * x_n - x_re * t_re - x_im * t_im), CLAMP_MIN)
    return jnp.sqrt(jnp.mean(alpha * la + beta * lp))


def _run_case(key, B, T, K, tile_t_override=None):
    k1, k2, k3, k4, k5, k6 = jax.random.split(key, 6)
    x = jax.random.normal(k1, (B, T), dtype=jnp.float32)
    target = jax.random.normal(k2, (B, T), dtype=jnp.float32)
    ty_x = jax.random.normal(k3, (B, T, K), dtype=jnp.float32)
    ty_target = jax.random.normal(k4, (B, T, K), dtype=jnp.float32)
    proj_x = jax.random.normal(k5, (B, K), dtype=jnp.float32)
    proj_target = jax.random.normal(k6, (B, K), dtype=jnp.float32)

    loss = cf_loss_func_cond(x, target, ty_x, ty_target, proj_x, proj_target,
                             tile_t_override=tile_t_override)
    loss = jax.block_until_ready(loss)
    ref = _reference(x, target, ty_x, ty_target, proj_x, proj_target)
    assert jnp.allclose(loss, ref, rtol=1e-5, atol=1e-5), (B, T, K, loss, ref)


if __name__ == "__main__":
    key = jax.random.PRNGKey(0)
    k_small, k_auto, k_tiled, k_ragged = jax.random.split(key, 4)

    # Small module-consistent shapes: batch=2, seq=8, hidden=32 (single tile).
    _run_case(k_small, B=2, T=8, K=32)
    # Larger T, auto tile choice (fits a single block on all generations).
    _run_case(k_auto, B=2, T=1280, K=32)
    # Force the multi-step gridded path (5 steps of 256).
    _run_case(k_tiled, B=2, T=1280, K=32, tile_t_override=256)
    # Force the ragged-T padding path (T=1000 -> padded to 1024, 8 steps).
    _run_case(k_ragged, B=2, T=1000, K=32, tile_t_override=128)

    print("KERNEL_OK")
</pallas_src>

<mosaic_0001>
module attributes {stable_mosaic.version = 11 : i64} {
  func.func @_cf_loss_tile_kernel(%arg0: i32, %arg1: memref<2x8xf32, #tpu.memory_space<vmem>>, %arg2: memref<2x8xf32, #tpu.memory_space<vmem>>, %arg3: memref<2x8x32xf32, #tpu.memory_space<vmem>>, %arg4: memref<2x8x32xf32, #tpu.memory_space<vmem>>, %arg5: memref<2x32xf32, #tpu.memory_space<vmem>>, %arg6: memref<2x32xf32, #tpu.memory_space<vmem>>, %arg7: memref<1x8xf32, #tpu.memory_space<vmem>>) attributes {dimension_semantics = [#tpu.dimension_semantics<parallel>], iteration_bounds = array<i64: 1>, scalar_prefetch = 0 : i64, scratch_operands = 0 : i64, tpu.core_type = #tpu.core_type<tc>, window_params = [{transform_indices = @transform_0, window_bounds = array<i64: 2, 8>}, {transform_indices = @transform_1, window_bounds = array<i64: 2, 8>}, {transform_indices = @transform_2, window_bounds = array<i64: 2, 8, 32>}, {transform_indices = @transform_3, window_bounds = array<i64: 2, 8, 32>}, {pipeline_mode = #tpu.pipeline_mode<synchronous>, transform_indices = @transform_4, window_bounds = array<i64: 2, 32>}, {pipeline_mode = #tpu.pipeline_mode<synchronous>, transform_indices = @transform_5, window_bounds = array<i64: 2, 32>}, {transform_indices = @transform_6, window_bounds = array<i64: 1, 8>}]} {
    %c0 = arith.constant 0 : index
    %c0_0 = arith.constant 0 : index
    %0 = vector.load %arg1[%c0, %c0_0] : memref<2x8xf32, #tpu.memory_space<vmem>>, vector<2x8xf32>
    %c0_1 = arith.constant 0 : index
    %c0_2 = arith.constant 0 : index
    %1 = vector.load %arg2[%c0_1, %c0_2] : memref<2x8xf32, #tpu.memory_space<vmem>>, vector<2x8xf32>
    %c0_3 = arith.constant 0 : index
    %c0_4 = arith.constant 0 : index
    %c0_5 = arith.constant 0 : index
    %2 = vector.load %arg3[%c0_3, %c0_4, %c0_5] : memref<2x8x32xf32, #tpu.memory_space<vmem>>, vector<2x8x32xf32>
    %c0_6 = arith.constant 0 : index
    %c0_7 = arith.constant 0 : index
    %c0_8 = arith.constant 0 : index
    %3 = vector.load %arg4[%c0_6, %c0_7, %c0_8] : memref<2x8x32xf32, #tpu.memory_space<vmem>>, vector<2x8x32xf32>
    %c0_9 = arith.constant 0 : index
    %c0_10 = arith.constant 0 : index
    %4 = vector.load %arg5[%c0_9, %c0_10] : memref<2x32xf32, #tpu.memory_space<vmem>>, vector<2x32xf32>
    %5 = vector.shape_cast %4 : vector<2x32xf32> to vector<2x1x32xf32>
    %c0_11 = arith.constant 0 : index
    %c0_12 = arith.constant 0 : index
    %6 = vector.load %arg6[%c0_11, %c0_12] : memref<2x32xf32, #tpu.memory_space<vmem>>, vector<2x32xf32>
    %7 = vector.shape_cast %6 : vector<2x32xf32> to vector<2x1x32xf32>
    %8 = vector.broadcast %5 : vector<2x1x32xf32> to vector<2x8x32xf32>
    %9 = arith.mulf %2, %8 : vector<2x8x32xf32>
    %cst = arith.constant dense<0.000000e+00> : vector<2x8xf32>
    %10 = vector.multi_reduction <add>, %9, %cst [2] : vector<2x8x32xf32> to vector<2x8xf32>
    %11 = vector.broadcast %7 : vector<2x1x32xf32> to vector<2x8x32xf32>
    %12 = arith.mulf %3, %11 : vector<2x8x32xf32>
    %cst_13 = arith.constant dense<0.000000e+00> : vector<2x8xf32>
    %13 = vector.multi_reduction <add>, %12, %cst_13 [2] : vector<2x8x32xf32> to vector<2x8xf32>
    %14 = arith.addf %0, %10 : vector<2x8xf32>
    %15 = math.cos %14 : vector<2x8xf32>
    %cst_14 = arith.constant dense<0.000000e+00> : vector<8xf32>
    %16 = vector.multi_reduction <add>, %15, %cst_14 [0] : vector<2x8xf32> to vector<8xf32>
    %17 = vector.shape_cast %16 : vector<8xf32> to vector<1x8xf32>
    %cst_15 = arith.constant 2.000000e+00 : f32
    %18 = vector.broadcast %cst_15 : f32 to vector<1x8xf32>
    %19 = arith.divf %17, %18 : vector<1x8xf32>
    %20 = math.sin %14 : vector<2x8xf32>
    %cst_16 = arith.constant dense<0.000000e+00> : vector<8xf32>
    %21 = vector.multi_reduction <add>, %20, %cst_16 [0] : vector<2x8xf32> to vector<8xf32>
    %22 = vector.shape_cast %21 : vector<8xf32> to vector<1x8xf32>
    %cst_17 = arith.constant 2.000000e+00 : f32
    %23 = vector.broadcast %cst_17 : f32 to vector<1x8xf32>
    %24 = arith.divf %22, %23 : vector<1x8xf32>
    %25 = arith.mulf %19, %19 : vector<1x8xf32>
    %26 = arith.mulf %24, %24 : vector<1x8xf32>
    %27 = arith.addf %25, %26 : vector<1x8xf32>
    %28 = math.sqrt %27 : vector<1x8xf32>
    %29 = arith.addf %1, %13 : vector<2x8xf32>
    %30 = math.cos %29 : vector<2x8xf32>
    %cst_18 = arith.constant dense<0.000000e+00> : vector<8xf32>
    %31 = vector.multi_reduction <add>, %30, %cst_18 [0] : vector<2x8xf32> to vector<8xf32>
    %32 = vector.shape_cast %31 : vector<8xf32> to vector<1x8xf32>
    %cst_19 = arith.constant 2.000000e+00 : f32
    %33 = vector.broadcast %cst_19 : f32 to vector<1x8xf32>
    %34 = arith.divf %32, %33 : vector<1x8xf32>
    %35 = math.sin %29 : vector<2x8xf32>
    %cst_20 = arith.constant dense<0.000000e+00> : vector<8xf32>
    %36 = vector.multi_reduction <add>, %35, %cst_20 [0] : vector<2x8xf32> to vector<8xf32>
    %37 = vector.shape_cast %36 : vector<8xf32> to vector<1x8xf32>
    %cst_21 = arith.constant 2.000000e+00 : f32
    %38 = vector.broadcast %cst_21 : f32 to vector<1x8xf32>
    %39 = arith.divf %37, %38 : vector<1x8xf32>
    %40 = arith.mulf %34, %34 : vector<1x8xf32>
    %41 = arith.mulf %39, %39 : vector<1x8xf32>
    %42 = arith.addf %40, %41 : vector<1x8xf32>
    %43 = math.sqrt %42 : vector<1x8xf32>
    %44 = arith.subf %43, %28 : vector<1x8xf32>
    %45 = arith.mulf %44, %44 : vector<1x8xf32>
    %cst_22 = arith.constant 9.99999996E-13 : f32
    %46 = vector.broadcast %cst_22 : f32 to vector<1x8xf32>
    %47 = arith.maximumf %45, %46 : vector<1x8xf32>
    %48 = arith.mulf %43, %28 : vector<1x8xf32>
    %49 = arith.mulf %19, %34 : vector<1x8xf32>
    %50 = arith.subf %48, %49 : vector<1x8xf32>
    %51 = arith.mulf %24, %39 : vector<1x8xf32>
    %52 = arith.subf %50, %51 : vector<1x8xf32>
    %cst_23 = arith.constant 2.000000e+00 : f32
    %53 = vector.broadcast %cst_23 : f32 to vector<1x8xf32>
    %54 = arith.mulf %53, %52 : vector<1x8xf32>
    %cst_24 = arith.constant 9.99999996E-13 : f32
    %55 = vector.broadcast %cst_24 : f32 to vector<1x8xf32>
    %56 = arith.maximumf %54, %55 : vector<1x8xf32>
    %cst_25 = arith.constant 5.000000e-01 : f32
    %57 = vector.broadcast %cst_25 : f32 to vector<1x8xf32>
    %58 = arith.mulf %57, %47 : vector<1x8xf32>
    %cst_26 = arith.constant 5.000000e-01 : f32
    %59 = vector.broadcast %cst_26 : f32 to vector<1x8xf32>
    %60 = arith.mulf %59, %56 : vector<1x8xf32>
    %61 = arith.addf %58, %60 : vector<1x8xf32>
    %c0_27 = arith.constant 0 : index
    %c0_28 = arith.constant 0 : index
    %62 = vector.load %arg7[%c0_27, %c0_28] : memref<1x8xf32, #tpu.memory_space<vmem>>, vector<1x8xf32>
    tpu.vector_store %arg7[%c0_27, %c0_28], %61 {strides = array<i32>} : memref<1x8xf32, #tpu.memory_space<vmem>>, vector<1x8xf32>,
    return
  }
  func.func @transform_0(%arg0: i32) -> (i32, i32) {
    %c0_i32 = arith.constant 0 : i32
    %c0_i32_0 = arith.constant 0 : i32
    return %c0_i32, %arg0 : i32, i32
  }
  func.func @transform_1(%arg0: i32) -> (i32, i32) {
    %c0_i32 = arith.constant 0 : i32
    %c0_i32_0 = arith.constant 0 : i32
    return %c0_i32, %arg0 : i32, i32
  }
  func.func @transform_2(%arg0: i32) -> (i32, i32, i32) {
    %c0_i32 = arith.constant 0 : i32
    %c0_i32_0 = arith.constant 0 : i32
    %c0_i32_1 = arith.constant 0 : i32
    return %c0_i32, %arg0, %c0_i32_0 : i32, i32, i32
  }
  func.func @transform_3(%arg0: i32) -> (i32, i32, i32) {
    %c0_i32 = arith.constant 0 : i32
    %c0_i32_0 = arith.constant 0 : i32
    %c0_i32_1 = arith.constant 0 : i32
    return %c0_i32, %arg0, %c0_i32_0 : i32, i32, i32
  }
  func.func @transform_4(%arg0: i32) -> (i32, i32) {
    %c0_i32 = arith.constant 0 : i32
    %c0_i32_0 = arith.constant 0 : i32
    %c0_i32_1 = arith.constant 0 : i32
    return %c0_i32, %c0_i32_0 : i32, i32
  }
  func.func @transform_5(%arg0: i32) -> (i32, i32) {
    %c0_i32 = arith.constant 0 : i32
    %c0_i32_0 = arith.constant 0 : i32
    %c0_i32_1 = arith.constant 0 : i32
    return %c0_i32, %c0_i32_0 : i32, i32
  }
  func.func @transform_6(%arg0: i32) -> (i32, i32) {
    %c0_i32 = arith.constant 0 : i32
    %c0_i32_0 = arith.constant 0 : i32
    return %c0_i32, %arg0 : i32, i32
  }
}

</mosaic_0001>

<bundles_post_ra>
// kernel: tpu_custom_call.1
= control target key start
LH: loop header
LB: loop body
LE: loop exit
PB: predicated region body
PF: predicated region fallthrough
CT: control target
= control target key end

     0   :  { %11 = vsyncpa [#allocation3], 0  ;;  %s1304_s0 = inlined_call_operand.hbm [shape: f32[2,8], index: 0, kind: input, shape index: {}]   ;;  %s1305_s1 = inlined_call_operand.hbm [shape: f32[2,8], index: 1, kind: input, shape index: {}]   ;;  %s1306_s2 = inlined_call_operand.hbm [shape: f32[2,8,32], index: 2, kind: input, shape index: {}]   ;;  %s1307_s3 = inlined_call_operand.hbm [shape: f32[2,8,32], index: 3, kind: input, shape index: {}]   ;;  %s1308_s4 = inlined_call_operand.vmem [shape: f32[2,32], index: 4, kind: input, shape index: {}]   ;;  %s1309_s5 = inlined_call_operand.vmem [shape: f32[2,32], index: 5, kind: input, shape index: {}]   ;;  %s1310_s6 = inlined_call_operand.hbm [shape: f32[1,8], index: 6, kind: output, shape index: {}]  }
   0x1   :  { %12 = vsyncpa [#allocation6], 0 }
   0x2   :  { %13 = vsyncpa [#allocation9], 0  ;;  %s31_s23 = sshll.u32 %s1305_s1, 4  ;;  %s32_s23 = int_to_ptr.hbm [resolvable:$true] %s31_s23 }
   0x3   :  { %14 = vsyncpa [#allocation4], 0  ;;  %s1020_s24 = smov [#allocation5]   ;;  %s20_s28 = sshll.u32 %s1304_s0, 4  ;;  %s21_s28 = int_to_ptr.hbm [resolvable:$true] %s20_s28 }
   0x4   :  { %s33_s25 = sshll.u32 %s1020_s24, 4  ;;  %s1021_s29 = smov [#allocation2]   ;;  %s34_s25 = int_to_ptr.vmem [resolvable:$true] %s33_s25 }
   0x5   :  { %36 = dma.hbm_to_vmem [thread:$0]  %s32_s23, 32, %s34_s25, [#allocation6]  }
   0x6   :  { %s22_s30 = sshll.u32 %s1021_s29, 4  ;;  %s41_s9 = sshll.u32 %s1306_s2, 4  ;;  %s23_s30 = int_to_ptr.vmem [resolvable:$true] %s22_s30  ;;  %s42_s9 = int_to_ptr.hbm [resolvable:$true] %s41_s9 }
   0x7   :  { %25 = dma.hbm_to_vmem [thread:$0]  %s21_s28, 32, %s23_s30, [#allocation3]  }
   0x8   :  { %s1022_s1 = smov [#allocation7]   ;;  %s54_s13 = sshll.u32 %s1307_s3, 4  ;;  %s55_s13 = int_to_ptr.hbm [resolvable:$true] %s54_s13 }
   0x9   :  { %s43_s10 = sshll.u32 %s1022_s1, 4  ;;  %s1023_s14 = smov 128   ;;  %s44_s10 = int_to_ptr.vmem [resolvable:$true] %s43_s10 }
   0xa   :  { %s1024_s0 = smov 8   ;;  %s1025_s15 = smov [#allocation8]  }
   0xb   :  { %49 = dma.hbm_to_vmem [thread:$0]  %s42_s9, 256, %s44_s10, [#allocation6], %s1023_s14, %s1023_s14, %s1024_s0  }
   0xc   :  { %s56_s16 = sshll.u32 %s1025_s15, 4  ;;  %s57_s16 = int_to_ptr.vmem [resolvable:$true] %s56_s16 }
   0xd   :  { %62 = dma.hbm_to_vmem [thread:$0]  %s55_s13, 256, %s57_s16, [#allocation9], %s1023_s14, %s1023_s14, %s1024_s0  }
   0xe   :  { %1012 = dma.done.wait [#allocation3], 32  }
   0xf   :  { %1013 = vsyncadd [#allocation3], 4294967264 }
  0x10   :  { %1014 = dma.done.wait [#allocation6], 288  }
  0x11   :  { %1015 = vsyncadd [#allocation6], 4294967008 }
  0x12   :  { %1016 = dma.done.wait [#allocation9], 256  }
  0x13   :  { %1017 = vsyncadd [#allocation9], 4294967040  ;;  %v87_v0 = vld [vmem:[#allocation8] sm:$0xff]  ;;  %v92_v1 = vld [vmem:[%s1309_s5] sm:$0x3]  ;;  %vm101_vm0 = vcmask 261120   ;;  %v122_v21 = vlaneseq }
  0x14   :  { %v108_v2 = vperm.slane %v92_v1, 0  ;;  %v85_v3 = vld [vmem:[#allocation7] sm:$0xff]  ;;  %v89_v4 = vld [vmem:[%s1308_s4] sm:$0x3]  ;;  %v94_v5 = vrot.slane %v92_v1, 1  ;;  %v86_v14 = vld [vmem:[#allocation7 + $0x8] sm:$0xff] }
  0x15   :  { %v95_v6 = vperm.slane %v89_v4, 0  ;;  %v91_v7 = vrot.slane %v89_v4, 1  ;;  %v88_v11 = vld [vmem:[#allocation8 + $0x8] sm:$0xff]  ;;  %v123_v23 = vand.u32 127, %v122_v21  ;;  %vm126_vm1 = vcmask 1041409   ;;  %s1034_s4 = smov [#allocation10]  }
  0x16   :  { %v112_v8 = vmul.f32 %v108_v2, %v87_v0  ;;  %v109_v9 = vperm.slane %v94_v5, 0  ;;  %v84_v26 = vld [vmem:[#allocation5] sm:$0x3]  ;;  %v83_v30 = vld [vmem:[#allocation2] sm:$0x3]  ;;  %s845_s5 = sshll.u32 %s1034_s4, 4  ;;  %s846_s5 = int_to_ptr.vmem [resolvable:$true] %s845_s5 }
  0x17   :  { %v99_v10 = vmul.f32 %v95_v6, %v85_v3  ;;  %v96_v12 = vperm.slane %v91_v7, 0  ;;  %v1026_v59 = vmov 683565275   ;;  %v1027_v61 = vmov 2475754826   ;;  %s847_s21 = sshll.u32 %s1310_s6, 4  ;;  %s848_s21 = int_to_ptr.hbm [resolvable:$true] %s847_s21 }
  0x18   :  { %v114_v13 = vsel %vm101_vm0, %v112_v8, 0.0  ;;  %v113_v16 = vmul.f32 %v109_v9, %v88_v11  ;;  %v1028_v1 = vmov 2131351028   ;;  %v1029_v4 = vmov 2102212464  }
  0x19   :  { %115 = vadd.xlane.f32.xlu1 %v114_v13  ;;  %v102_v15 = vsel %vm101_vm0, %v99_v10, 0.0  ;;  %v100_v17 = vmul.f32 %v96_v12, %v86_v14  ;;  %v1030_v7 = vmov 920167782   ;;  %v1031_v10 = vmov 1326507024  }
  0x1a   :  { %103 = vadd.xlane.f32.xlu0 %v102_v15  ;;  %v117_v18 = vsel %vm101_vm0, %v113_v16, 0.0 }
  0x1b   :  { %v105_v19 = vsel %vm101_vm0, %v100_v17, 0.0 }
  0x21   :  { %118 = vadd.xlane.f32.xlu1 %v117_v18 }
  0x22   :  { %106 = vadd.xlane.f32.xlu0 %v105_v19 }
  0x8c   :  { %v116_v20 = vpop.xlane.xlu1 %115 }
  0x8d   :  { %v104_v22 = vpop.xlane.xlu0 %103  ;;  %v480_v25 = vperm.slane %v116_v20, %v123_v23 }
  0x8e   :  { %v124_v29 = vperm.slane %v104_v22, %v123_v23 }
  0x94   :  { %v119_v24 = vpop.xlane.xlu1 %118 }
  0x95   :  { %v481_v27 = vperm.slane %v119_v24, %v123_v23  ;;  %v107_v28 = vpop.xlane.xlu0 %106 }
  0x96   :  { %v125_v31 = vperm.slane %v107_v28, %v123_v23 }
  0x97   :  { %v482_v32 = vsel %vm126_vm1, %v481_v27, %v480_v25 }
  0x98   :  { %v1092_v33 = vadd.f32 %v482_v32, %v84_v26  ;;  %v127_v34 = vsel %vm126_vm1, %v125_v31, %v124_v29 }
  0x99   :  { %v1094_v35 = vadd.f32 %v127_v34, %v83_v30 }
  0x9a   :  { %v485_v36 = vand.u32 2147483647, %v1092_v33  ;;  %v488_v37 = vand.u32 2139095040, %v1092_v33 }
  0x9b   :  { %v130_v38 = vand.u32 2147483647, %v1094_v35  ;;  %v133_v39 = vand.u32 2139095040, %v1094_v35 }
  0x9c   :  { %v489_v40 = vshrl.u32 %v488_v37, 23  ;;  %v492_v41 = vand.u32 8388607, %v485_v36 }
  0x9d   :  { %v134_v42 = vshrl.u32 %v133_v39, 23  ;;  %v137_v45 = vand.u32 8388607, %v130_v38 }
  0x9e   :  { %v865_v43 = vadd.s32 4294967169, %v489_v40  ;;  %v493_v44 = vor.u32 8388608, %v492_v41 }
  0x9f   :  { %v859_v46 = vadd.s32 4294967169, %v134_v42  ;;  %v138_v50 = vor.u32 8388608, %v137_v45 }
  0xa0   :  { %v495_v47 = vadd.s32 1, %v865_v43  ;;  %v1104_v49 = vshll.u32 %v493_v44, 8 }
  0xa1   :  { %v140_v48 = vadd.s32 1, %v859_v46  ;;  %v1111_v57 = vshll.u32 %v138_v50, 8 }
  0xa2   :  { %vm496_vm2 = vcmp.gt.s32.totalorder %v495_v47, 0  ;;  %v1107_v55 = vand.u32 65535, %v1104_v49  ;;  %v535_v63 = vshrl.u32 %v1104_v49, 16 }
  0xa3   :  { %v497_v51 = vsel %vm496_vm2, %v495_v47, 0  ;;  %vm141_vm3 = vcmp.gt.s32.totalorder %v140_v48, 0 }
  0xa4   :  { %v499_v52 = vand.u32 31, %v497_v51  ;;  %v142_v53 = vsel %vm141_vm3, %v140_v48, 0  ;;  %v1113_v58 = vshrl.u32 %v497_v51, 5 }
  0xa5   :  { %v1109_v56 = vand.u32 31, %v142_v53  ;;  %v1151_v42 = vshrl.u32 %v142_v53, 5 }
  0xa6   :  { %v500_v54 = vsub.s32 32, %v499_v52  ;;  %v502_v60 = vshll.u32 %v1026_v59, %v499_v52  ;;  %v505_v62 = vshll.u32 %v1027_v61, %v499_v52  ;;  %v508_v3 = vshll.u32 %v1028_v1, %v499_v52 }
  0xa7   :  { %v511_v6 = vshll.u32 %v1029_v4, %v499_v52  ;;  %v514_v9 = vshll.u32 %v1030_v7, %v499_v52  ;;  %v1123_v15 = vsub.s32 32, %v1109_v56  ;;  %vm517_vm4 = vcmp.lt.s32.totalorder %v1113_v58, 1 }
  0xa8   :  { %v503_v0 = vshrl.u32 %v1027_v61, %v500_v54  ;;  %v506_v2 = vshrl.u32 %v1028_v1, %v500_v54  ;;  %v509_v5 = vshrl.u32 %v1029_v4, %v500_v54  ;;  %v512_v8 = vshrl.u32 %v1030_v7, %v500_v54 }
  0xa9   :  { %v515_v11 = vshrl.u32 %v1031_v10, %v500_v54  ;;  %vm518_vm5 = vcmp.lt.s32.totalorder %v1113_v58, 2  ;;  %v501_v18 = vshrl.u32 %v1026_v59, %v500_v54  ;;  %vm520_vm6 = vcmp.lt.s32.totalorder %v1113_v58, 4 }
  0xaa   :  { %v504_v12 = vor.u32 %v503_v0, %v502_v60  ;;  %v507_v13 = vor.u32 %v506_v2, %v505_v62  ;;  %v510_v14 = vor.u32 %v509_v5, %v508_v3  ;;  %v513_v16 = vor.u32 %v512_v8, %v511_v6 }
  0xab   :  { %v516_v17 = vor.u32 %v515_v11, %v514_v9  ;;  %vm519_vm7 = vcmp.lt.s32.totalorder %v1113_v58, 3  ;;  %v147_v23 = vshll.u32 %v1026_v59, %v1109_v56  ;;  %v148_v27 = vshrl.u32 %v1027_v61, %v1123_v15 }
  0xac   :  { %v525_v19 = vsel %vm517_vm4, %v504_v12, %v507_v13  ;;  %v529_v20 = vsel %vm517_vm4, %v507_v13, %v510_v14  ;;  %v526_v21 = vsel %vm520_vm6, %v513_v16, 920167782  ;;  %v522_v24 = vsel %vm520_vm6, %v510_v14, 2102212464 }
  0xad   :  { %v530_v22 = vsel %vm520_vm6, %v516_v17, 1326507024  ;;  %v527_v25 = vsel %vm519_vm7, %v510_v14, %v526_v21  ;;  %v150_v30 = vshll.u32 %v1027_v61, %v1109_v56  ;;  %v151_v31 = vshrl.u32 %v1028_v1, %v1123_v15 }
  0xae   :  { %v531_v26 = vsel %vm519_vm7, %v513_v16, %v530_v22  ;;  %v528_v28 = vsel %vm518_vm5, %v525_v19, %v527_v25  ;;  %v521_v40 = vsel %vm517_vm4, %v501_v18, %v504_v12  ;;  %v523_v41 = vsel %vm519_vm7, %v507_v13, %v522_v24 }
  0xaf   :  { %v532_v29 = vsel %vm518_vm5, %v529_v20, %v531_v26  ;;  %v558_v37 = vand.u32 65535, %v528_v28  ;;  %v559_v39 = vshrl.u32 %v528_v28, 16  ;;  %v1153_v43 = vor.u32 %v148_v27, %v147_v23 }
  0xb0   :  { %v536_v32 = vand.u32 65535, %v532_v29  ;;  %v537_v34 = vshrl.u32 %v532_v29, 16  ;;  %v1156_v46 = vor.u32 %v151_v31, %v150_v30  ;;  %v154_v47 = vshrl.u32 %v1029_v4, %v1123_v15 }
  0xb1   :  { %v561_v50 = vmul.u32 %v559_v39, %v1107_v55  ;;  %v562_v51 = vmul.u32 %v558_v37, %v535_v63  ;;  %v153_v52 = vshll.u32 %v1028_v1, %v1109_v56  ;;  %v560_v60 = vmul.u32 %v558_v37, %v1107_v55 }
  0xb2   :  { %v539_v44 = vmul.u32 %v537_v34, %v1107_v55  ;;  %v540_v45 = vmul.u32 %v536_v32, %v535_v63  ;;  %v538_v48 = vmul.u32 %v536_v32, %v1107_v55  ;;  %v541_v54 = vmul.u32 %v537_v34, %v535_v63 }
  0xb3   :  { %v563_v61 = vmul.u32 %v559_v39, %v535_v63  ;;  %v564_v3 = vshll.u32 %v561_v50, 16  ;;  %v566_v6 = vshll.u32 %v562_v51, 16  ;;  %v1164_v8 = vor.u32 %v154_v47, %v153_v52 }
  0xb4   :  { %v542_v53 = vshll.u32 %v539_v44, 16  ;;  %v543_v62 = vshrl.u32 %v539_v44, 16  ;;  %v544_v0 = vshll.u32 %v540_v45, 16  ;;  %v545_v2 = vshrl.u32 %v540_v45, 16 }
  0xb5   :  { %v1032_v9 = vmov 0   ;;  %vm568_vm9 = vc.u32 %v560_v60, %v564_v3  ;;  %v570_v12 = vadd.s32 %v564_v3, %v560_v60  ;;  %v157_v1 = vshrl.u32 %v1030_v7, %v1123_v15 }
  0xb6   :  { %vm546_vm8 = vc.u32 %v538_v48, %v542_v53  ;;  %v548_v5 = vadd.s32 %v542_v53, %v538_v48  ;;  %v569_v55 = vsel %vm568_vm9, 1, %v1032_v9  ;;  %v156_v63 = vshll.u32 %v1029_v4, %v1109_v56 }
  0xb7   :  { %v547_v11 = vsel %vm546_vm8, 1, %v1032_v9  ;;  %v571_v16 = vadd.s32 %v569_v55, %v563_v61  ;;  %vm572_vm11 = vc.u32 %v570_v12, %v566_v6  ;;  %v159_v17 = vshll.u32 %v1030_v7, %v1109_v56 }
  0xb8   :  { %v549_v13 = vadd.s32 %v547_v11, %v541_v54  ;;  %vm550_vm10 = vc.u32 %v548_v5, %v544_v0  ;;  %v573_v19 = vsel %vm572_vm11, 1, %v1032_v9  ;;  %v158_v20 = vor.u32 %v157_v1, %v156_v63 }
  0xb9   :  { %v551_v14 = vsel %vm550_vm10, 1, %v1032_v9  ;;  %v160_v21 = vshrl.u32 %v1031_v10, %v1123_v15  ;;  %v565_v22 = vshrl.u32 %v561_v50, 16  ;;  %v567_v23 = vshrl.u32 %v562_v51, 16 }
  0xba   :  { %v553_v18 = vadd.s32 %v551_v14, %v549_v13  ;;  %v1178_v24 = vadd.s32 %v570_v12, %v566_v6  ;;  %v575_v25 = vadd.s32 %v573_v19, %v571_v16  ;;  %vm162_vm12 = vcmp.lt.s32.totalorder %v1151_v42, 1 }
  0xbb   :  { %v161_v26 = vor.u32 %v160_v21, %v159_v17  ;;  %vm165_vm13 = vcmp.lt.s32.totalorder %v1151_v42, 4  ;;  %vm164_vm14 = vcmp.lt.s32.totalorder %v1151_v42, 3  ;;  %v170_v56 = vsel %vm162_vm12, %v1153_v43, %v1156_v46 }
  0xbc   :  { %v554_v4 = vadd.s32 %v553_v18, %v543_v62  ;;  %v576_v27 = vadd.s32 %v575_v25, %v565_v22  ;;  %v171_v7 = vsel %vm165_vm13, %v158_v20, 920167782  ;;  %vm163_vm15 = vcmp.lt.s32.totalorder %v1151_v42, 2 }
  0xbd   :  { %v172_v28 = vsel %vm164_vm14, %v1164_v8, %v171_v7  ;;  %v174_v29 = vsel %vm162_vm12, %v1156_v46, %v1164_v8  ;;  %v524_v30 = vsel %vm518_vm5, %v521_v40, %v523_v41  ;;  %v175_v34 = vsel %vm165_vm13, %v161_v26, 1326507024 }
  0xbe   :  { %v1189_v10 = vadd.s32 %v554_v4, %v545_v2  ;;  %v577_v31 = vadd.s32 %v576_v27, %v567_v23  ;;  %v173_v32 = vsel %vm163_vm15, %v170_v56, %v172_v28  ;;  %v176_v37 = vsel %vm164_vm14, %v158_v20, %v175_v34 }
  0xbf   :  { %v179_v39 = vand.u32 65535, %v1111_v57  ;;  %v203_v44 = vand.u32 65535, %v173_v32  ;;  %v177_v58 = vsel %vm163_vm15, %v174_v29, %v176_v37  ;;  %v180_v40 = vshrl.u32 %v1111_v57, 16 }
  0xc0   :  { %vm580_vm0 = vc.u32 %v1189_v10, %v1178_v24  ;;  %v581_v45 = vadd.s32 1, %v577_v31  ;;  %v204_v41 = vshrl.u32 %v173_v32, 16  ;;  %v578_v47 = vmul.u32 %v1104_v49, %v524_v30 }
  0xc1   :  { %v181_v48 = vand.u32 65535, %v177_v58  ;;  %v182_v50 = vshrl.u32 %v177_v58, 16  ;;  %v207_v54 = vmul.u32 %v203_v44, %v180_v40  ;;  %v205_v62 = vmul.u32 %v203_v44, %v179_v39 }
  0xc2   :  { %v582_v51 = vsel %vm580_vm0, %v581_v45, %v577_v31  ;;  %v206_v52 = vmul.u32 %v204_v41, %v179_v39  ;;  %v208_v0 = vmul.u32 %v204_v41, %v180_v40  ;;  %v167_v19 = vsel %vm165_vm13, %v1164_v8, 2102212464 }
  0xc3   :  { %v583_v53 = vadd.s32 %v582_v51, %v578_v47  ;;  %v184_v60 = vmul.u32 %v182_v50, %v179_v39  ;;  %v185_v61 = vmul.u32 %v181_v48, %v180_v40  ;;  %v183_v5 = vmul.u32 %v181_v48, %v179_v39 }
  0xc4   :  { %v209_v2 = vshll.u32 %v206_v52, 16  ;;  %v186_v6 = vmul.u32 %v182_v50, %v180_v40  ;;  %v211_v1 = vshll.u32 %v207_v54, 16  ;;  %v146_v23 = vshrl.u32 %v1026_v59, %v1123_v15 }
  0xc5   :  { %v584_v3 = vadd.s32 536870912, %v583_v53  ;;  %v187_v11 = vshll.u32 %v184_v60, 16  ;;  %v189_v12 = vshll.u32 %v185_v61, 16  ;;  %v188_v26 = vshrl.u32 %v184_v60, 16 }
  0xc6   :  { %vm213_vm1 = vc.u32 %v205_v62, %v209_v2  ;;  %v215_v13 = vadd.s32 %v209_v2, %v205_v62  ;;  %v210_v27 = vshrl.u32 %v206_v52, 16  ;;  %v166_v7 = vsel %vm162_vm12, %v146_v23, %v1153_v43 }
  0xc7   :  { %v1214_v49 = vshrl.u32 %v584_v3, 30  ;;  %vm191_vm2 = vc.u32 %v183_v5, %v187_v11  ;;  %v193_v55 = vadd.s32 %v187_v11, %v183_v5  ;;  %v214_v63 = vsel %vm213_vm1, 1, %v1032_v9 }
  0xc8   :  { %v192_v14 = vsel %vm191_vm2, 1, %v1032_v9  ;;  %v216_v16 = vadd.s32 %v214_v63, %v208_v0  ;;  %vm217_vm3 = vc.u32 %v215_v13, %v211_v1  ;;  %v168_v8 = vsel %vm164_vm14, %v1156_v46, %v167_v19 }
  0xc9   :  { %v586_v17 = vshll.u32 %v1214_v49, 30  ;;  %v194_v18 = vadd.s32 %v192_v14, %v186_v6  ;;  %vm195_vm4 = vc.u32 %v193_v55, %v189_v12  ;;  %v218_v21 = vsel %vm217_vm3, 1, %v1032_v9 }
  0xca   :  { %v196_v20 = vsel %vm195_vm4, 1, %v1032_v9  ;;  %v220_v4 = vadd.s32 %v218_v21, %v216_v16  ;;  %v190_v28 = vshrl.u32 %v185_v61, 16  ;;  %v212_v29 = vshrl.u32 %v207_v54, 16 }
  0xcb   :  { %v587_v22 = vsub.s32 %v583_v53, %v586_v17  ;;  %v198_v25 = vadd.s32 %v196_v20, %v194_v18  ;;  %v169_v34 = vsel %vm163_vm15, %v166_v7, %v168_v8  ;;  %v219_v37 = vadd.s32 %v215_v13, %v211_v1 }
  0xcc   :  { %v221_v30 = vadd.s32 %v220_v4, %v210_v27  ;;  %v223_v43 = vmul.u32 %v1111_v57, %v169_v34  ;;  %v579_v58 = vadd.s32 %v1178_v24, %v1189_v10  ;;  %vm487_vm9 = vcmp.lt.s32.totalorder %v1092_v33, 0 }
  0xcd   :  { %vm588_vm5 = vcmp.lt.s32.totalorder %v587_v22, 0  ;;  %v589_v56 = vsub.s32 0, %v587_v22  ;;  %v199_v9 = vadd.s32 %v198_v25, %v188_v26  ;;  %vm1243_vm10 = vcmp.le.f32.partialorder %v485_v36, 0.7853982 }
  0xce   :  { %v222_v32 = vadd.s32 %v221_v30, %v212_v29  ;;  %v609_v12 = vsub.s32 4, %v1214_v49  ;;  %v1033_v8 = vmov 2.0   ;;  %vm284_vm12 = vcmask 58368  }
  0xcf   :  { %v590_v31 = vsel %vm588_vm5, %v589_v56, %v587_v22  ;;  %v200_v15 = vadd.s32 %v199_v9, %v190_v28  ;;  %886 = vrcp.f32 %v1033_v8  ;;  %vm628_vm13 = vweird.f32 %v1092_v33 }
  0xd0   :  { %v591_v59 = vclz %v590_v31  ;;  %v226_v44 = vadd.s32 1, %v222_v32  ;;  %v610_v63 = vsel %vm487_vm9, %v609_v12, %v1214_v49  ;;  %vm1259_vm14 = vcmp.le.f32.partialorder %v130_v38, 0.7853982 }
  0xd1   :  { %vm225_vm6 = vc.u32 %v200_v15, %v219_v37  ;;  %v224_v18 = vadd.s32 %v219_v37, %v200_v15  ;;  %vm132_vm15 = vcmp.lt.s32.totalorder %v1094_v35, 0 }
  0xd2   :  { %v866_v39 = vadd.s32 4294967294, %v591_v59  ;;  %v227_v46 = vsel %vm225_vm6, %v226_v44, %v222_v32 }
  0xd3   :  { %v228_v47 = vadd.s32 %v227_v46, %v223_v43 }
  0xd4   :  { %vm867_vm7 = vcmp.lt.s32.totalorder %v866_v39, 0 }
  0xd5   :  { %v594_v45 = vsel %vm867_vm7, 0, %v866_v39  ;;  %v229_v42 = vadd.s32 536870912, %v228_v47  ;;  %v1254_v44 = vpop.eup %886 }
  0xd6   :  { %v595_v40 = vsub.s32 32, %v594_v45  ;;  %v599_v41 = vsub.s32 4294967266, %v594_v45  ;;  %v596_v48 = vshll.u32 %v587_v22, %v594_v45  ;;  %v612_v22 = vsel %vm1243_vm10, 0, %v610_v63 }
  0xd7   :  { %v1237_v53 = vshrl.u32 %v229_v42, 30  ;;  %v791_v9 = vadd.s32 3, %v612_v22  ;;  %v629_v59 = vand.u32 3, %v612_v22  ;;  %vm297_vm6 = vweird.f32 %v1254_v44 }
  0xd8   :  { %v597_v50 = vshrl.u32 %v579_v58, %v595_v40  ;;  %v600_v51 = vadd.s32 127, %v599_v41  ;;  %v293_v41 = vmul.f32 2.0, %v1254_v44 }
  0xd9   :  { %v231_v61 = vshll.u32 %v1237_v53, 30  ;;  %v792_v39 = vand.u32 3, %v791_v9  ;;  %vm630_vm0 = vcmp.lt.s32.totalorder %v629_v59, 2  ;;  %vm631_vm1 = vcmp.eq.s32.totalorder %v629_v59, 0 }
  0xda   :  { %v598_v52 = vor.u32 %v597_v50, %v596_v48  ;;  %v601_v54 = vshll.u32 %v600_v51, 23  ;;  %vm634_vm2 = vcmp.eq.s32.totalorder %v629_v59, 2  ;;  %v254_v48 = vsub.s32 4, %v1237_v53 }
  0xdb   :  { %v232_v0 = vsub.s32 %v228_v47, %v231_v61  ;;  %vm793_vm3 = vcmp.lt.s32.totalorder %v792_v39, 2  ;;  %vm794_vm4 = vcmp.eq.s32.totalorder %v792_v39, 0  ;;  %vm797_vm5 = vcmp.eq.s32.totalorder %v792_v39, 2 }
  0xdc   :  { %v602_v60 = vor.u32 4788187, %v601_v54  ;;  %v605_v62 = vcvt.s32.f32 %v598_v52 }
  0xdd   :  { %vm233_vm8 = vcmp.lt.s32.totalorder %v232_v0, 0  ;;  %v234_v24 = vsub.s32 0, %v232_v0 }
  0xde   :  { %v603_v57 = vand.u32 2147483647, %v602_v60 }
  0xdf   :  { %v235_v3 = vsel %vm233_vm8, %v234_v24, %v232_v0  ;;  %v255_v24 = vsel %vm132_vm15, %v254_v48, %v1237_v53 }
  0xe0   :  { %v606_v2 = vmul.f32 %v605_v62, %v603_v57  ;;  %v236_v5 = vclz %v235_v3  ;;  %v294_v62 = vsub.f32 1.0, %v293_v41 }
  0xe2   :  { %v607_v10 = vxor.u32 2147483648, %v606_v2  ;;  %v860_v13 = vadd.s32 4294967294, %v236_v5 }
  0xe4   :  { %v608_v11 = vsel %vm487_vm9, %v607_v10, %v606_v2  ;;  %vm861_vm11 = vcmp.lt.s32.totalorder %v860_v13, 0 }
  0xe5   :  { %v611_v1 = vsel %vm1243_vm10, %v1092_v33, %v608_v11  ;;  %v239_v17 = vsel %vm861_vm11, 0, %v860_v13  ;;  %v257_v33 = vsel %vm1259_vm14, 0, %v255_v24 }
  0xe6   :  { %v613_v55 = vmul.f32 %v611_v1, %v611_v1  ;;  %v240_v36 = vsub.s32 32, %v239_v17  ;;  %v244_v19 = vsub.s32 4294967266, %v239_v17  ;;  %v241_v23 = vshll.u32 %v232_v0, %v239_v17 }
  0xe8   :  { %v614_v14 = vmul.f32 -0.001358992, %v613_v55  ;;  %v621_v16 = vmul.f32 -0.00019511016, %v613_v55  ;;  %v242_v25 = vshrl.u32 %v224_v18, %v240_v36  ;;  %v245_v4 = vadd.s32 127, %v244_v19 }
  0xea   :  { %v615_v20 = vadd.f32 0.041655596, %v614_v14  ;;  %v622_v21 = vadd.f32 0.008332121, %v621_v16  ;;  %v243_v56 = vor.u32 %v242_v25, %v241_v23  ;;  %v246_v7 = vshll.u32 %v245_v4, 23 }
  0xec   :  { %v616_v26 = vmul.f32 %v615_v20, %v613_v55  ;;  %v623_v27 = vmul.f32 %v622_v21, %v613_v55  ;;  %v247_v29 = vor.u32 4788187, %v246_v7  ;;  %v250_v32 = vcvt.s32.f32 %v243_v56 }
  0xed   :  { %v444_v20 = vadd.s32 3, %v257_v33 }
  0xee   :  { %v617_v49 = vadd.f32 -0.4999988, %v616_v26  ;;  %v624_v28 = vadd.f32 -0.16666654, %v623_v27  ;;  %v248_v15 = vand.u32 2147483647, %v247_v29 }
  0xef   :  { %v274_v26 = vand.u32 3, %v257_v33 }
  0xf0   :  { %v618_v30 = vmul.f32 %v617_v49, %v613_v55  ;;  %v625_v31 = vmul.f32 %v624_v28, %v613_v55  ;;  %v251_v43 = vmul.f32 %v250_v32, %v248_v15  ;;  %v295_v55 = vmul.f32 %v1254_v44, %v294_v62 }
  0xf1   :  { %v445_v49 = vand.u32 3, %v444_v20  ;;  %vm275_vm7 = vcmp.lt.s32.totalorder %v274_v26, 2  ;;  %vm276_vm8 = vcmp.eq.s32.totalorder %v274_v26, 0  ;;  %vm279_vm9 = vcmp.eq.s32.totalorder %v274_v26, 2 }
  0xf2   :  { %v619_v34 = vadd.f32 1.0, %v618_v30  ;;  %v626_v37 = vadd.f32 1.0, %v625_v31  ;;  %v252_v40 = vxor.u32 2147483648, %v251_v43  ;;  %v296_v21 = vadd.f32 %v1254_v44, %v295_v55 }
  0xf3   :  { %vm446_vm10 = vcmp.lt.s32.totalorder %v445_v49, 2  ;;  %vm447_vm11 = vcmp.eq.s32.totalorder %v445_v49, 0 }
  0xf4   :  { %v627_v45 = vmul.f32 %v626_v37, %v611_v1  ;;  %v635_v46 = vxor.u32 2147483648, %v619_v34  ;;  %v253_v38 = vsel %vm132_vm15, %v252_v40, %v251_v43  ;;  %v298_v28 = vsel %vm297_vm6, %v1254_v44, %v296_v21 }
  0xf5   :  { %v256_v54 = vsel %vm1259_vm14, %v1094_v35, %v253_v38  ;;  %vm273_vm14 = vweird.f32 %v1094_v35 }
  0xf6   :  { %v632_v47 = vxor.u32 2147483648, %v627_v45  ;;  %v636_v50 = vsel %vm634_vm2, %v635_v46, %v627_v45  ;;  %v799_v52 = vsel %vm797_vm5, %v635_v46, %v627_v45  ;;  %v258_v57 = vmul.f32 %v256_v54, %v256_v54 }
  0xf7   :  { %vm838_vm2 = vcmask 57344  }
  0xf8   :  { %v633_v51 = vsel %vm631_vm1, %v619_v34, %v632_v47  ;;  %v796_v42 = vsel %vm794_vm4, %v619_v34, %v632_v47  ;;  %v259_v5 = vmul.f32 -0.001358992, %v258_v57  ;;  %v266_v6 = vmul.f32 -0.00019511016, %v258_v57 }
  0xf9   :  { %v637_v60 = vsel %vm630_vm0, %v633_v51, %v636_v50  ;;  %v800_v61 = vsel %vm793_vm3, %v796_v42, %v799_v52 }
  0xfa   :  { %v638_v0 = vsel %vm628_vm13, nan, %v637_v60  ;;  %v801_v2 = vsel %vm628_vm13, nan, %v800_v61  ;;  %v260_v1 = vadd.f32 0.041655596, %v259_v5  ;;  %v267_v13 = vadd.f32 0.008332121, %v266_v6 }
  0xfb   :  { %v639_v10 = vsel %vm284_vm12, %v638_v0, 0.0  ;;  %v802_v3 = vsel %vm284_vm12, %v801_v2, 0.0  ;;  %vm450_vm13 = vcmp.eq.s32.totalorder %v445_v49, 2 }
  0xfc   :  { %v640_v11 = vrot.slane %v639_v10, 4  ;;  %v803_v12 = vrot.slane %v802_v3, 4  ;;  %v261_v16 = vmul.f32 %v260_v1, %v258_v57  ;;  %v268_v17 = vmul.f32 %v267_v13, %v258_v57 }
  0xfe   :  { %v641_v63 = vadd.f32 %v640_v11, %v639_v10  ;;  %v804_v14 = vadd.f32 %v803_v12, %v802_v3  ;;  %v262_v36 = vadd.f32 -0.4999988, %v261_v16  ;;  %v269_v19 = vadd.f32 -0.16666654, %v268_v17 }
 0x100   :  { %v642_v53 = vrot.slane %v641_v63, 2  ;;  %v805_v18 = vrot.slane %v804_v14, 2  ;;  %v263_v25 = vmul.f32 %v262_v36, %v258_v57  ;;  %v270_v4 = vmul.f32 %v269_v19, %v258_v57 }
 0x102   :  { %v643_v22 = vadd.f32 %v642_v53, %v641_v63  ;;  %v806_v23 = vadd.f32 %v805_v18, %v804_v14  ;;  %v264_v7 = vadd.f32 1.0, %v263_v25  ;;  %v271_v8 = vadd.f32 1.0, %v270_v4 }
 0x104   :  { %v644_v27 = vrot.slane %v643_v22, 1  ;;  %v807_v56 = vrot.slane %v806_v23, 1  ;;  %v272_v30 = vmul.f32 %v271_v8, %v256_v54  ;;  %v280_v31 = vxor.u32 2147483648, %v264_v7 }
 0x106   :  { %v645_v9 = vadd.f32 %v644_v27, %v643_v22  ;;  %v808_v29 = vadd.f32 %v807_v56, %v806_v23  ;;  %v277_v32 = vxor.u32 2147483648, %v272_v30  ;;  %v281_v44 = vsel %vm279_vm9, %v280_v31, %v272_v30 }
 0x107   :  { %v452_v45 = vsel %vm450_vm13, %v280_v31, %v272_v30 }
 0x108   :  { %v1287_v59 = vmul.f32 %v645_v9, %v298_v28  ;;  %v1289_v15 = vmul.f32 %v808_v29, %v298_v28  ;;  %v278_v39 = vsel %vm276_vm8, %v264_v7, %v277_v32  ;;  %v449_v43 = vsel %vm447_vm11, %v264_v7, %v277_v32 }
 0x109   :  { %v282_v46 = vsel %vm275_vm7, %v278_v39, %v281_v44  ;;  %v453_v58 = vsel %vm446_vm10, %v449_v43, %v452_v45 }
 0x10a   :  { %v810_v34 = vmul.f32 %v1287_v59, %v1287_v59  ;;  %v811_v37 = vmul.f32 %v1289_v15, %v1289_v15  ;;  %v283_v41 = vsel %vm273_vm14, nan, %v282_v46  ;;  %v454_v47 = vsel %vm273_vm14, nan, %v453_v58 }
 0x10b   :  { %v285_v48 = vsel %vm284_vm12, %v283_v41, 0.0  ;;  %v455_v50 = vsel %vm284_vm12, %v454_v47, 0.0 }
 0x10c   :  { %v812_v40 = vadd.f32 %v811_v37, %v810_v34  ;;  %v286_v38 = vrot.slane %v285_v48, 4  ;;  %v456_v51 = vrot.slane %v455_v50, 4 }
 0x10e   :  { %888 = vrsqrt.f32 %v812_v40  ;;  %v287_v42 = vadd.f32 %v286_v38, %v285_v48  ;;  %v457_v52 = vadd.f32 %v456_v51, %v455_v50  ;;  %vm820_vm12 = vcmp.eq.f32.partialorder %v812_v40, inf }
 0x10f   :  { %v823_v20 = vand.u32 2147483648, %v812_v40  ;;  %vm822_vm15 = vcmp.eq.f32.partialorder %v812_v40, 0.0 }
 0x110   :  { %v288_v54 = vrot.slane %v287_v42, 2  ;;  %v458_v60 = vrot.slane %v457_v52, 2 }
 0x112   :  { %v289_v57 = vadd.f32 %v288_v54, %v287_v42  ;;  %v459_v35 = vadd.f32 %v458_v60, %v457_v52 }
 0x114   :  { %v889_v61 = vpop.eup %888  ;;  %v290_v62 = vrot.slane %v289_v57, 1  ;;  %v460_v0 = vrot.slane %v459_v35, 1 }
 0x115   :  { %v814_v2 = vmul.f32 %v889_v61, %v812_v40 }
 0x116   :  { %v291_v24 = vadd.f32 %v290_v62, %v289_v57  ;;  %v461_v10 = vadd.f32 %v460_v0, %v459_v35 }
 0x117   :  { %v815_v6 = vmul.f32 %v889_v61, %v814_v2 }
 0x118   :  { %v299_v3 = vmul.f32 %v298_v28, %v291_v24  ;;  %v462_v5 = vmul.f32 %v461_v10, %v298_v28 }
 0x119   :  { %v816_v13 = vmul.f32 0.5, %v815_v6 }
 0x11a   :  { %v463_v11 = vmul.f32 %v299_v3, %v299_v3  ;;  %v464_v12 = vmul.f32 %v462_v5, %v462_v5  ;;  %v829_v56 = vmul.f32 %v1287_v59, %v299_v3  ;;  %v831_v49 = vmul.f32 %v1289_v15, %v462_v5 }
 0x11b   :  { %v817_v55 = vsub.f32 1.5, %v816_v13 }
 0x11c   :  { %v465_v1 = vadd.f32 %v464_v12, %v463_v11 }
 0x11d   :  { %v818_v14 = vmul.f32 %v889_v61, %v817_v55 }
 0x11e   :  { %890 = vrsqrt.f32 %v465_v1  ;;  %vm473_vm0 = vcmp.eq.f32.partialorder %v465_v1, inf  ;;  %v476_v22 = vand.u32 2147483648, %v465_v1  ;;  %vm475_vm1 = vcmp.eq.f32.partialorder %v465_v1, 0.0 }
 0x11f   :  { %v819_v53 = vmul.f32 %v818_v14, %v812_v40 }
 0x121   :  { %v821_v19 = vsel %vm820_vm12, %v812_v40, %v819_v53 }
 0x122   :  { %v824_v23 = vsel %vm822_vm15, %v823_v20, %v821_v19 }
 0x124   :  { %v891_v63 = vpop.eup %890 }
 0x125   :  { %v467_v33 = vmul.f32 %v891_v63, %v465_v1 }
 0x127   :  { %v468_v16 = vmul.f32 %v891_v63, %v467_v33 }
 0x129   :  { %v469_v17 = vmul.f32 0.5, %v468_v16 }
 0x12b   :  { %v470_v18 = vsub.f32 1.5, %v469_v17 }
 0x12d   :  { %v471_v36 = vmul.f32 %v891_v63, %v470_v18 }
 0x12f   :  { %v472_v21 = vmul.f32 %v471_v36, %v465_v1 }
 0x131   :  { %v474_v25 = vsel %vm473_vm0, %v465_v1, %v472_v21 }
 0x132   :  { %v477_v4 = vsel %vm475_vm1, %v476_v22, %v474_v25 }
 0x133   :  { %v825_v26 = vsub.f32 %v824_v23, %v477_v4  ;;  %v828_v27 = vmul.f32 %v824_v23, %v477_v4 }
 0x135   :  { %v826_v7 = vmul.f32 %v825_v26, %v825_v26  ;;  %v830_v8 = vsub.f32 %v828_v27, %v829_v56 }
 0x137   :  { %v832_v28 = vsub.f32 %v830_v8, %v831_v49  ;;  %v827_v9 = vmax.f32 %v826_v7, 1e-12 }
 0x139   :  { %v833_v29 = vmul.f32 2.0, %v832_v28  ;;  %v835_v31 = vmul.f32 0.5, %v827_v9 }
 0x13b   :  { %v834_v30 = vmax.f32 %v833_v29, 1e-12 }
 0x13d   :  { %v836_v32 = vmul.f32 0.5, %v834_v30 }
 0x13f   :  { %v837_v34 = vadd.f32 %v836_v32, %v835_v31 }
 0x141   :  { %839 = vst.msk [vmem:[#allocation10] sm:$0x1] %vm838_vm2, %v837_v34 }
 0x142   :  { %850 = dma.vmem_to_hbm [thread:$0]  %s846_s5, 16, %s848_s21, [#allocation4]  }
 0x143   :  { %1018 = dma.done.wait [#allocation4], 16  }
 0x144   :  { %1019 = vsyncadd [#allocation4], 4294967280 }
 0x145   :  { %855 = vsyncpa [#allocation3], 1 }
 0x146   :  { %856 = vsyncpa [#allocation6], 1 }
 0x147   :  { %857 = vsyncpa [#allocation9], 1 }
 0x148   :  { %858 = vsyncpa [#allocation4], 1 }

</bundles_post_ra>
